<compile_context>
chip_gen: v7x
topology: tpu7x:2x2x1
jax: 0.10.0
libtpu: 0.0.40
codegen_flags: <defaults>
</compile_context>

<pallas_src>
import functools

import jax
import jax.numpy as jnp
import numpy as np
from jax import lax
from jax.experimental import pallas as pl
from jax.experimental.pallas import tpu as pltpu

SUB = 8                 # sublanes per vreg tile
LANE = 128              # lanes per vreg tile
TILE_B = SUB * LANE     # independent decoders per (8,128) state plane
DIM = 2                 # n_features == hidden_dim == 2
N_PARAMS = 16           # w_ih(4) + w_hh(4) + w_reg(4) + (b_ih+b_hh)(2) + b_reg(2)
MAX_T_CHUNK = 128       # timesteps per output block (streams T to HBM)


def decoder_kernel(params_ref, state_ref, traj_ref, carry_ref, *, t_chunk, unroll):
    """One (batch-tile, T-chunk) grid step of the fused autoregressive rollout.

    params_ref : SMEM (16,) f32
                 [w_ih(4 row-major), w_hh(4), w_reg(4), b_ih+b_hh(2), b_reg(2)]
    state_ref  : VMEM (4, 8, 128) f32 — planes [p0, p1, h0, h1]; each plane
                 holds up to 1024 independent decoders (sublane x lane).
    traj_ref   : VMEM (t_chunk, 4, 8, 128) f32 — per step: planes
                 [new_point_x, new_point_y, new_hidden_0, new_hidden_1].
    carry_ref  : VMEM (4, 8, 128) f32 scratch — recurrent state carried across
                 T-chunks of the same batch tile.
    """
    # Hoist the 16 scalar->vreg splats out of the step loop (loop-invariant
    # vregs; Mosaic does not CSE broadcasts emitted inside an unrolled body).
    def bc(i):
        return jnp.full((SUB, LANE), params_ref[i], dtype=jnp.float32)

    (w_ih00, w_ih01, w_ih10, w_ih11,
     w_hh00, w_hh01, w_hh10, w_hh11,
     w_rg00, w_rg01, w_rg10, w_rg11,
     b_pre0, b_pre1, b_rg0, b_rg1) = [bc(i) for i in range(N_PARAMS)]

    # First T-chunk of this batch tile: load the initial state into the carry.
    @pl.when(pl.program_id(1) == 0)
    def _():
        carry_ref[...] = state_ref[...]

    p0 = carry_ref[0]
    p1 = carry_ref[1]
    h0 = carry_ref[2]
    h1 = carry_ref[3]

    def body(t, carry):
        p0, p1, h0, h1 = carry
        # pre = W_ih @ p + W_hh @ h + (b_ih + b_hh), balanced-tree association
        # (pure VPU MACs; 2x2 matmuls never touch the MXU).
        pre0 = (p0 * w_ih00 + p1 * w_ih01) + (h0 * w_hh00 + h1 * w_hh01) + b_pre0
        pre1 = (p0 * w_ih10 + p1 * w_ih11) + (h0 * w_hh10 + h1 * w_hh11) + b_pre1
        nh0 = jnp.tanh(pre0)                      # EUP
        nh1 = jnp.tanh(pre1)
        # new_point = W_reg @ new_hidden + b_reg
        np0 = (nh0 * w_rg00 + nh1 * w_rg01) + b_rg0
        np1 = (nh0 * w_rg10 + nh1 * w_rg11) + b_rg1
        # Four full, unmasked (8,128) stores per step; every element of this
        # output block gets written exactly once -> no zero-fill pass needed.
        traj_ref[t, 0, :, :] = np0
        traj_ref[t, 1, :, :] = np1
        traj_ref[t, 2, :, :] = nh0
        traj_ref[t, 3, :, :] = nh1
        # Autoregressive feedback: carry stays in vregs within the chunk.
        return np0, np1, nh0, nh1

    p0, p1, h0, h1 = lax.fori_loop(0, t_chunk, body, (p0, p1, h0, h1),
                                   unroll=unroll)

    # Persist the recurrent state for the next T-chunk of this batch tile.
    carry_ref[0] = p0
    carry_ref[1] = p1
    carry_ref[2] = h0
    carry_ref[3] = h1


def _rollout_call(packed_params, state, num_steps, max_chunk=MAX_T_CHUNK):
    """state: (nb, 4, 8, 128) f32  ->  traj: (nb, t_pad, 4, 8, 128) f32."""
    nb = state.shape[0]
    t_chunk = min(num_steps, max_chunk)
    nt = pl.cdiv(num_steps, t_chunk)
    unroll = min(8, t_chunk)   # bounded unroll: the recurrence is serial anyway

    kernel = functools.partial(decoder_kernel, t_chunk=t_chunk, unroll=unroll)
    return pl.pallas_call(
        kernel,
        out_shape=jax.ShapeDtypeStruct((nb, nt * t_chunk, 4, SUB, LANE),
                                       jnp.float32),
        grid=(nb, nt),
        in_specs=[
            pl.BlockSpec(memory_space=pltpu.MemorySpace.SMEM),        # params
            pl.BlockSpec((None, 4, SUB, LANE), lambda b, t: (b, 0, 0, 0)),
        ],
        out_specs=pl.BlockSpec((None, t_chunk, 4, SUB, LANE),
                               lambda b, t: (b, t, 0, 0, 0)),
        scratch_shapes=[pltpu.VMEM((4, SUB, LANE), jnp.float32)],      # carry
        compiler_params=pltpu.CompilerParams(
            dimension_semantics=("parallel", "arbitrary")),
    )(packed_params, state)


def pack_params(params):
    """Flatten params into one (16,) f32 array; b_ih + b_hh fused. Done ONCE."""
    w_ih, b_ih, w_hh, b_hh, w_reg, b_reg = params
    return jnp.concatenate([
        w_ih.reshape(-1), w_hh.reshape(-1), w_reg.reshape(-1),
        (b_ih + b_hh).reshape(-1), b_reg.reshape(-1),
    ]).astype(jnp.float32)


@functools.partial(jax.jit, static_argnames=("num_steps", "max_chunk"))
def decoder_rollout(packed_params, point, hidden, num_steps,
                    max_chunk=MAX_T_CHUNK):
    """Run `num_steps` autoregressive decoder steps in a single pallas_call.

    point, hidden: (2,)  ->  returns (points (T,2), hiddens (T,2)).
    """
    state = jnp.zeros((1, 4, SUB, LANE), jnp.float32)
    state = state.at[0, 0, 0, 0].set(point[0].astype(jnp.float32))
    state = state.at[0, 1, 0, 0].set(point[1].astype(jnp.float32))
    state = state.at[0, 2, 0, 0].set(hidden[0].astype(jnp.float32))
    state = state.at[0, 3, 0, 0].set(hidden[1].astype(jnp.float32))
    traj = _rollout_call(packed_params, state, num_steps, max_chunk)
    traj = traj[0, :num_steps, :, 0, 0]          # (T, 4)
    return traj[:, 0:2], traj[:, 2:4]


def decoder_forward(packed_params, point, hidden):
    """Single step — identical semantics to Decoder.forward(point, hidden)."""
    points, hiddens = decoder_rollout(packed_params, point, hidden, num_steps=1)
    return points[0], hiddens[0]


@jax.jit
def decoder_forward_batch(packed_params, points, hiddens):
    """Batched single step: B independent states; batch fills whole (8,128)
    vreg planes; B > 1024 spills onto extra tiles on the 'parallel' grid axis."""
    B = points.shape[0]
    nb = -(-B // TILE_B)

    def plane(v):
        buf = jnp.zeros((nb * TILE_B,), jnp.float32).at[:B].set(
            v.astype(jnp.float32))
        return buf.reshape(nb, SUB, LANE)

    state = jnp.stack([plane(points[:, 0]), plane(points[:, 1]),
                       plane(hiddens[:, 0]), plane(hiddens[:, 1])], axis=1)
    traj = _rollout_call(packed_params, state, 1)          # (nb,1,4,8,128)
    out = traj[:, 0].reshape(nb, 4, TILE_B)                # (nb,4,1024)
    out = jnp.moveaxis(out, 1, 0).reshape(4, nb * TILE_B)[:, :B]   # (4,B)
    return out[0:2].T, out[2:4].T                          # (B,2), (B,2)


def _ref_step(point, hidden, params):
    """Pure-JAX reference matching the PyTorch forward (in f32)."""
    w_ih, b_ih, w_hh, b_hh, w_reg, b_reg = [p.astype(jnp.float32) for p in params]
    pretan = w_ih @ point + b_ih + w_hh @ hidden + b_hh
    new_hidden = jnp.tanh(pretan)
    new_point = w_reg @ new_hidden + b_reg
    return new_point, new_hidden


def make_params():
    """Deterministic parameters copied from the module's __init__."""
    w_reg = jnp.array([[-0.1802, -0.3691], [-0.0514, 0.4502]], jnp.float32)
    b_reg = jnp.array([0.3566, -0.3189], jnp.float32)
    w_ih = jnp.array([[0.6627, -0.4245], [0.5373, 0.2294]], jnp.float32)
    b_ih = jnp.array([0.4954, 0.6533], jnp.float32)
    w_hh = jnp.array([[-0.4015, -0.5385], [-0.1956, -0.6835]], jnp.float32)
    b_hh = jnp.array([-0.3565, -0.2904], jnp.float32)
    return (w_ih, b_ih, w_hh, b_hh, w_reg, b_reg)


if __name__ == "__main__":
    key = jax.random.PRNGKey(0)
    k_point, k_hidden, k_bp, k_bh = jax.random.split(key, 4)
    point = jax.random.normal(k_point, (DIM,), dtype=jnp.float32)
    hidden = jax.random.normal(k_hidden, (DIM,), dtype=jnp.float32)

    params = make_params()
    packed = pack_params(params)          # packed once, reused for every call

    # --- single step (module-exact forward) ---------------------------------
    new_point, new_hidden = decoder_forward(packed, point, hidden)
    jax.block_until_ready((new_point, new_hidden))
    ref_point, ref_hidden = _ref_step(point, hidden, params)
    np.testing.assert_allclose(np.asarray(new_point), np.asarray(ref_point),
                               rtol=1e-5, atol=1e-5)
    np.testing.assert_allclose(np.asarray(new_hidden), np.asarray(ref_hidden),
                               rtol=1e-5, atol=1e-5)

    def ref_rollout(p, h, T):
        def step(carry, _):
            np_, nh_ = _ref_step(carry[0], carry[1], params)
            return (np_, nh_), (np_, nh_)
        _, (ps, hs) = lax.scan(step, (p, h), None, length=T)
        return ps, hs

    # --- short rollout with a tiny T-chunk (exercises carry across chunks) --
    T_small = 16
    pts, hids = decoder_rollout(packed, point, hidden, num_steps=T_small,
                                max_chunk=4)
    jax.block_until_ready((pts, hids))
    rpts, rhids = ref_rollout(point, hidden, T_small)
    np.testing.assert_allclose(np.asarray(pts), np.asarray(rpts),
                               rtol=1e-5, atol=1e-5)
    np.testing.assert_allclose(np.asarray(hids), np.asarray(rhids),
                               rtol=1e-5, atol=1e-5)

    # --- longer streamed rollout (2 x 128-step chunks); tolerance is looser
    #     because f32 rounding / tanh ULP differences compound over an
    #     autoregressive recurrence.
    T_long = 160
    pts, hids = decoder_rollout(packed, point, hidden, num_steps=T_long)
    jax.block_until_ready((pts, hids))
    rpts, rhids = ref_rollout(point, hidden, T_long)
    np.testing.assert_allclose(np.asarray(pts), np.asarray(rpts),
                               rtol=2e-3, atol=2e-3)
    np.testing.assert_allclose(np.asarray(hids), np.asarray(rhids),
                               rtol=2e-3, atol=2e-3)

    # --- batched single step (B spans multiple sublanes of the state planes) -
    B = 300
    points_b = jax.random.normal(k_bp, (B, DIM), dtype=jnp.float32)
    hiddens_b = jax.random.normal(k_bh, (B, DIM), dtype=jnp.float32)
    np_b, nh_b = decoder_forward_batch(packed, points_b, hiddens_b)
    jax.block_until_ready((np_b, nh_b))
    rp_b, rh_b = jax.vmap(lambda p, h: _ref_step(p, h, params))(points_b,
                                                                hiddens_b)
    np.testing.assert_allclose(np.asarray(np_b), np.asarray(rp_b),
                               rtol=1e-5, atol=1e-5)
    np.testing.assert_allclose(np.asarray(nh_b), np.asarray(rh_b),
                               rtol=1e-5, atol=1e-5)

    print("KERNEL_OK")
</pallas_src>

<mosaic_0001>
module attributes {stable_mosaic.version = 11 : i64} {
  func.func @decoder_kernel(%arg0: i32, %arg1: i32, %arg2: memref<16xf32, #tpu.memory_space<smem>>, %arg3: memref<1x4x8x128xf32, #tpu.memory_space<vmem>>, %arg4: memref<1x1x4x8x128xf32, #tpu.memory_space<vmem>>, %arg5: memref<4x8x128xf32, #tpu.memory_space<vmem>>) attributes {dimension_semantics = [#tpu.dimension_semantics<parallel>, #tpu.dimension_semantics<arbitrary>], iteration_bounds = array<i64: 1, 1>, scalar_prefetch = 0 : i64, scratch_operands = 1 : i64, tpu.core_type = #tpu.core_type<tc>, window_params = [{transform_indices = @transform_0, window_bounds = array<i64: 16>}, {transform_indices = @transform_1, window_bounds = array<i64: 1, 4, 8, 128>}, {transform_indices = @transform_2, window_bounds = array<i64: 1, 1, 4, 8, 128>}]} {
    %c0 = arith.constant 0 : index
    %0 = memref.load %arg2[%c0] : memref<16xf32, #tpu.memory_space<smem>>
    %1 = vector.broadcast %0 : f32 to vector<8x128xf32>
    %c1 = arith.constant 1 : index
    %2 = memref.load %arg2[%c1] : memref<16xf32, #tpu.memory_space<smem>>
    %3 = vector.broadcast %2 : f32 to vector<8x128xf32>
    %c2 = arith.constant 2 : index
    %4 = memref.load %arg2[%c2] : memref<16xf32, #tpu.memory_space<smem>>
    %5 = vector.broadcast %4 : f32 to vector<8x128xf32>
    %c3 = arith.constant 3 : index
    %6 = memref.load %arg2[%c3] : memref<16xf32, #tpu.memory_space<smem>>
    %7 = vector.broadcast %6 : f32 to vector<8x128xf32>
    %c4 = arith.constant 4 : index
    %8 = memref.load %arg2[%c4] : memref<16xf32, #tpu.memory_space<smem>>
    %9 = vector.broadcast %8 : f32 to vector<8x128xf32>
    %c5 = arith.constant 5 : index
    %10 = memref.load %arg2[%c5] : memref<16xf32, #tpu.memory_space<smem>>
    %11 = vector.broadcast %10 : f32 to vector<8x128xf32>
    %c6 = arith.constant 6 : index
    %12 = memref.load %arg2[%c6] : memref<16xf32, #tpu.memory_space<smem>>
    %13 = vector.broadcast %12 : f32 to vector<8x128xf32>
    %c7 = arith.constant 7 : index
    %14 = memref.load %arg2[%c7] : memref<16xf32, #tpu.memory_space<smem>>
    %15 = vector.broadcast %14 : f32 to vector<8x128xf32>
    %c8 = arith.constant 8 : index
    %16 = memref.load %arg2[%c8] : memref<16xf32, #tpu.memory_space<smem>>
    %17 = vector.broadcast %16 : f32 to vector<8x128xf32>
    %c9 = arith.constant 9 : index
    %18 = memref.load %arg2[%c9] : memref<16xf32, #tpu.memory_space<smem>>
    %19 = vector.broadcast %18 : f32 to vector<8x128xf32>
    %c10 = arith.constant 10 : index
    %20 = memref.load %arg2[%c10] : memref<16xf32, #tpu.memory_space<smem>>
    %21 = vector.broadcast %20 : f32 to vector<8x128xf32>
    %c11 = arith.constant 11 : index
    %22 = memref.load %arg2[%c11] : memref<16xf32, #tpu.memory_space<smem>>
    %23 = vector.broadcast %22 : f32 to vector<8x128xf32>
    %c12 = arith.constant 12 : index
    %24 = memref.load %arg2[%c12] : memref<16xf32, #tpu.memory_space<smem>>
    %25 = vector.broadcast %24 : f32 to vector<8x128xf32>
    %c13 = arith.constant 13 : index
    %26 = memref.load %arg2[%c13] : memref<16xf32, #tpu.memory_space<smem>>
    %27 = vector.broadcast %26 : f32 to vector<8x128xf32>
    %c14 = arith.constant 14 : index
    %28 = memref.load %arg2[%c14] : memref<16xf32, #tpu.memory_space<smem>>
    %29 = vector.broadcast %28 : f32 to vector<8x128xf32>
    %c15 = arith.constant 15 : index
    %30 = memref.load %arg2[%c15] : memref<16xf32, #tpu.memory_space<smem>>
    %31 = vector.broadcast %30 : f32 to vector<8x128xf32>
    %c0_i32 = arith.constant 0 : i32
    %32 = arith.cmpi eq, %arg1, %c0_i32 : i32
    %33 = arith.extui %32 : i1 to i32
    %c0_i32_0 = arith.constant 0 : i32
    %34 = arith.cmpi ne, %33, %c0_i32_0 : i32
    scf.if %34 {
      %c0_42 = arith.constant 0 : index
      %c0_43 = arith.constant 0 : index
      %c0_44 = arith.constant 0 : index
      %c0_45 = arith.constant 0 : index
      %97 = vector.load %arg3[%c0_42, %c0_43, %c0_44, %c0_45] : memref<1x4x8x128xf32, #tpu.memory_space<vmem>>, vector<1x4x8x128xf32>
      %98 = vector.shape_cast %97 : vector<1x4x8x128xf32> to vector<4x8x128xf32>
      %c0_46 = arith.constant 0 : index
      %c0_47 = arith.constant 0 : index
      %c0_48 = arith.constant 0 : index
      %99 = vector.load %arg5[%c0_46, %c0_47, %c0_48] : memref<4x8x128xf32, #tpu.memory_space<vmem>>, vector<4x8x128xf32>
      tpu.vector_store %arg5[%c0_46, %c0_47, %c0_48], %98 {strides = array<i32>} : memref<4x8x128xf32, #tpu.memory_space<vmem>>, vector<4x8x128xf32>,
    } else {
    }
    %c0_1 = arith.constant 0 : index
    %c0_2 = arith.constant 0 : index
    %c0_3 = arith.constant 0 : index
    %35 = vector.load %arg5[%c0_1, %c0_2, %c0_3] : memref<4x8x128xf32, #tpu.memory_space<vmem>>, vector<1x8x128xf32>
    %36 = vector.shape_cast %35 : vector<1x8x128xf32> to vector<8x128xf32>
    %c1_4 = arith.constant 1 : index
    %c0_5 = arith.constant 0 : index
    %c0_6 = arith.constant 0 : index
    %37 = vector.load %arg5[%c1_4, %c0_5, %c0_6] : memref<4x8x128xf32, #tpu.memory_space<vmem>>, vector<1x8x128xf32>
    %38 = vector.shape_cast %37 : vector<1x8x128xf32> to vector<8x128xf32>
    %c2_7 = arith.constant 2 : index
    %c0_8 = arith.constant 0 : index
    %c0_9 = arith.constant 0 : index
    %39 = vector.load %arg5[%c2_7, %c0_8, %c0_9] : memref<4x8x128xf32, #tpu.memory_space<vmem>>, vector<1x8x128xf32>
    %40 = vector.shape_cast %39 : vector<1x8x128xf32> to vector<8x128xf32>
    %c3_10 = arith.constant 3 : index
    %c0_11 = arith.constant 0 : index
    %c0_12 = arith.constant 0 : index
    %41 = vector.load %arg5[%c3_10, %c0_11, %c0_12] : memref<4x8x128xf32, #tpu.memory_space<vmem>>, vector<1x8x128xf32>
    %42 = vector.shape_cast %41 : vector<1x8x128xf32> to vector<8x128xf32>
    %c0_i32_13 = arith.constant 0 : i32
    %43 = arith.mulf %36, %1 : vector<8x128xf32>
    %44 = arith.mulf %38, %3 : vector<8x128xf32>
    %45 = arith.addf %43, %44 : vector<8x128xf32>
    %46 = arith.mulf %40, %9 : vector<8x128xf32>
    %47 = arith.mulf %42, %11 : vector<8x128xf32>
    %48 = arith.addf %46, %47 : vector<8x128xf32>
    %49 = arith.addf %45, %48 : vector<8x128xf32>
    %50 = arith.addf %49, %25 : vector<8x128xf32>
    %51 = arith.mulf %36, %5 : vector<8x128xf32>
    %52 = arith.mulf %38, %7 : vector<8x128xf32>
    %53 = arith.addf %51, %52 : vector<8x128xf32>
    %54 = arith.mulf %40, %13 : vector<8x128xf32>
    %55 = arith.mulf %42, %15 : vector<8x128xf32>
    %56 = arith.addf %54, %55 : vector<8x128xf32>
    %57 = arith.addf %53, %56 : vector<8x128xf32>
    %58 = arith.addf %57, %27 : vector<8x128xf32>
    %59 = math.tanh %50 : vector<8x128xf32>
    %60 = math.tanh %58 : vector<8x128xf32>
    %61 = arith.mulf %59, %17 : vector<8x128xf32>
    %62 = arith.mulf %60, %19 : vector<8x128xf32>
    %63 = arith.addf %61, %62 : vector<8x128xf32>
    %64 = arith.addf %63, %29 : vector<8x128xf32>
    %65 = arith.mulf %59, %21 : vector<8x128xf32>
    %66 = arith.mulf %60, %23 : vector<8x128xf32>
    %67 = arith.addf %65, %66 : vector<8x128xf32>
    %68 = arith.addf %67, %31 : vector<8x128xf32>
    %c0_14 = arith.constant 0 : index
    %69 = arith.index_cast %c0_i32_13 : i32 to index
    %c0_15 = arith.constant 0 : index
    %c0_16 = arith.constant 0 : index
    %c0_17 = arith.constant 0 : index
    %70 = vector.load %arg4[%c0_14, %69, %c0_15, %c0_16, %c0_17] : memref<1x1x4x8x128xf32, #tpu.memory_space<vmem>>, vector<1x1x1x8x128xf32>
    %71 = vector.shape_cast %70 : vector<1x1x1x8x128xf32> to vector<8x128xf32>
    %72 = vector.shape_cast %64 : vector<8x128xf32> to vector<1x1x1x8x128xf32>
    tpu.vector_store %arg4[%c0_14, %69, %c0_15, %c0_16, %c0_17], %72 {strides = array<i32>} : memref<1x1x4x8x128xf32, #tpu.memory_space<vmem>>, vector<1x1x1x8x128xf32>,
    %c0_18 = arith.constant 0 : index
    %73 = arith.index_cast %c0_i32_13 : i32 to index
    %c1_19 = arith.constant 1 : index
    %c0_20 = arith.constant 0 : index
    %c0_21 = arith.constant 0 : index
    %74 = vector.load %arg4[%c0_18, %73, %c1_19, %c0_20, %c0_21] : memref<1x1x4x8x128xf32, #tpu.memory_space<vmem>>, vector<1x1x1x8x128xf32>
    %75 = vector.shape_cast %74 : vector<1x1x1x8x128xf32> to vector<8x128xf32>
    %76 = vector.shape_cast %68 : vector<8x128xf32> to vector<1x1x1x8x128xf32>
    tpu.vector_store %arg4[%c0_18, %73, %c1_19, %c0_20, %c0_21], %76 {strides = array<i32>} : memref<1x1x4x8x128xf32, #tpu.memory_space<vmem>>, vector<1x1x1x8x128xf32>,
    %c0_22 = arith.constant 0 : index
    %77 = arith.index_cast %c0_i32_13 : i32 to index
    %c2_23 = arith.constant 2 : index
    %c0_24 = arith.constant 0 : index
    %c0_25 = arith.constant 0 : index
    %78 = vector.load %arg4[%c0_22, %77, %c2_23, %c0_24, %c0_25] : memref<1x1x4x8x128xf32, #tpu.memory_space<vmem>>, vector<1x1x1x8x128xf32>
    %79 = vector.shape_cast %78 : vector<1x1x1x8x128xf32> to vector<8x128xf32>
    %80 = vector.shape_cast %59 : vector<8x128xf32> to vector<1x1x1x8x128xf32>
    tpu.vector_store %arg4[%c0_22, %77, %c2_23, %c0_24, %c0_25], %80 {strides = array<i32>} : memref<1x1x4x8x128xf32, #tpu.memory_space<vmem>>, vector<1x1x1x8x128xf32>,
    %c0_26 = arith.constant 0 : index
    %81 = arith.index_cast %c0_i32_13 : i32 to index
    %c3_27 = arith.constant 3 : index
    %c0_28 = arith.constant 0 : index
    %c0_29 = arith.constant 0 : index
    %82 = vector.load %arg4[%c0_26, %81, %c3_27, %c0_28, %c0_29] : memref<1x1x4x8x128xf32, #tpu.memory_space<vmem>>, vector<1x1x1x8x128xf32>
    %83 = vector.shape_cast %82 : vector<1x1x1x8x128xf32> to vector<8x128xf32>
    %84 = vector.shape_cast %60 : vector<8x128xf32> to vector<1x1x1x8x128xf32>
    tpu.vector_store %arg4[%c0_26, %81, %c3_27, %c0_28, %c0_29], %84 {strides = array<i32>} : memref<1x1x4x8x128xf32, #tpu.memory_space<vmem>>, vector<1x1x1x8x128xf32>,
    %c1_i32 = arith.constant 1 : i32
    %c0_30 = arith.constant 0 : index
    %c0_31 = arith.constant 0 : index
    %c0_32 = arith.constant 0 : index
    %85 = vector.load %arg5[%c0_30, %c0_31, %c0_32] : memref<4x8x128xf32, #tpu.memory_space<vmem>>, vector<1x8x128xf32>
    %86 = vector.shape_cast %85 : vector<1x8x128xf32> to vector<8x128xf32>
    %87 = vector.shape_cast %64 : vector<8x128xf32> to vector<1x8x128xf32>
    tpu.vector_store %arg5[%c0_30, %c0_31, %c0_32], %87 {strides = array<i32>} : memref<4x8x128xf32, #tpu.memory_space<vmem>>, vector<1x8x128xf32>,
    %c1_33 = arith.constant 1 : index
    %c0_34 = arith.constant 0 : index
    %c0_35 = arith.constant 0 : index
    %88 = vector.load %arg5[%c1_33, %c0_34, %c0_35] : memref<4x8x128xf32, #tpu.memory_space<vmem>>, vector<1x8x128xf32>
    %89 = vector.shape_cast %88 : vector<1x8x128xf32> to vector<8x128xf32>
    %90 = vector.shape_cast %68 : vector<8x128xf32> to vector<1x8x128xf32>
    tpu.vector_store %arg5[%c1_33, %c0_34, %c0_35], %90 {strides = array<i32>} : memref<4x8x128xf32, #tpu.memory_space<vmem>>, vector<1x8x128xf32>,
    %c2_36 = arith.constant 2 : index
    %c0_37 = arith.constant 0 : index
    %c0_38 = arith.constant 0 : index
    %91 = vector.load %arg5[%c2_36, %c0_37, %c0_38] : memref<4x8x128xf32, #tpu.memory_space<vmem>>, vector<1x8x128xf32>
    %92 = vector.shape_cast %91 : vector<1x8x128xf32> to vector<8x128xf32>
    %93 = vector.shape_cast %59 : vector<8x128xf32> to vector<1x8x128xf32>
    tpu.vector_store %arg5[%c2_36, %c0_37, %c0_38], %93 {strides = array<i32>} : memref<4x8x128xf32, #tpu.memory_space<vmem>>, vector<1x8x128xf32>,
    %c3_39 = arith.constant 3 : index
    %c0_40 = arith.constant 0 : index
    %c0_41 = arith.constant 0 : index
    %94 = vector.load %arg5[%c3_39, %c0_40, %c0_41] : memref<4x8x128xf32, #tpu.memory_space<vmem>>, vector<1x8x128xf32>
    %95 = vector.shape_cast %94 : vector<1x8x128xf32> to vector<8x128xf32>
    %96 = vector.shape_cast %60 : vector<8x128xf32> to vector<1x8x128xf32>
    tpu.vector_store %arg5[%c3_39, %c0_40, %c0_41], %96 {strides = array<i32>} : memref<4x8x128xf32, #tpu.memory_space<vmem>>, vector<1x8x128xf32>,
    return
  }
  func.func @transform_0(%arg0: i32, %arg1: i32) -> i32 {
    %c0_i32 = arith.constant 0 : i32
    %c0_i32_0 = arith.constant 0 : i32
    return %c0_i32 : i32
  }
  func.func @transform_1(%arg0: i32, %arg1: i32) -> (i32, i32, i32, i32) {
    %c0_i32 = arith.constant 0 : i32
    %c0_i32_0 = arith.constant 0 : i32
    %c0_i32_1 = arith.constant 0 : i32
    %c0_i32_2 = arith.constant 0 : i32
    return %arg0, %c0_i32, %c0_i32_0, %c0_i32_1 : i32, i32, i32, i32
  }
  func.func @transform_2(%arg0: i32, %arg1: i32) -> (i32, i32, i32, i32, i32) {
    %c0_i32 = arith.constant 0 : i32
    %c0_i32_0 = arith.constant 0 : i32
    %c0_i32_1 = arith.constant 0 : i32
    %c0_i32_2 = arith.constant 0 : i32
    return %arg0, %arg1, %c0_i32, %c0_i32_0, %c0_i32_1 : i32, i32, i32, i32, i32
  }
}

</mosaic_0001>

<bundles_post_ra>
// kernel: decoder_rollout.1
= control target key start
LH: loop header
LB: loop body
LE: loop exit
PB: predicated region body
PF: predicated region fallthrough
CT: control target
= control target key end

     0   :  { %7 = vsyncpa [#allocation4], 0  ;;  %s197_s0 = inlined_call_operand.vmem [shape: f32[16], index: 0, kind: input, shape index: {}]   ;;  %s198_s1 = inlined_call_operand.vmem [shape: f32[1,4,8,128], index: 1, kind: input, shape index: {}]   ;;  %s199_s2 = inlined_call_operand.vmem [shape: f32[1,1,4,8,128], index: 2, kind: output, shape index: {}]  }
   0x1   :  { %s14_s11 = sshll.u32 %s197_s0, 4  ;;  %s15_s11 = int_to_ptr.vmem [resolvable:$true] %s14_s11 }
   0x2   :  { %s140_s12 = scalar_lea.vmem %s15_s11, 16  ;;  %p145_p1 = scmp.lt.s32.totalorder %s15_s11, %s15_s11 }
   0x3   :  { %p141_p0 = scmp.ne.s32.totalorder %s15_s11, %s140_s12  ;;  %p146_p2 = scmp.lt.s32.totalorder %s140_s12, %s140_s12 }
   0x5   :  { %p147_p3 = por %p146_p2, %p145_p1 }
   0x7   :  { %p148_p4 = pnand %p147_p3, %p141_p0 }
   0x9   :  { %151 = shalt.err (!%p148_p4)
}
   0xa   :  { %s154_s13 = smov [#allocation3]  }
   0xb   :  { %17 = dma.vmem_to_smem %s15_s11, 16, %s154_s13, [#allocation4]  }
   0xc   :  { %152 = dma.done.wait [#allocation4], 16  }
   0xd   :  { %153 = vsyncadd [#allocation4], 4294967280 }
   0xe   :  { %23 = sfence }
   0xf   :  { %s24_s14 = sld [smem:[#allocation3]]  ;;  %s117_s15 = sld [smem:[#allocation3 + $0x1]]  ;;  %v60_v0 = vld [vmem:[%s198_s1] sm:$0xff]  ;;  %v61_v1 = vld [vmem:[%s198_s1 + $0x8] sm:$0xff]  ;;  %v62_v4 = vld [vmem:[%s198_s1 + $0x10] sm:$0xff] }
  0x10   :  { %s118_s16 = sld [smem:[#allocation3 + $0x2]]  ;;  %s119_s17 = sld [smem:[#allocation3 + $0x3]]  ;;  %v63_v7 = vld [vmem:[%s198_s1 + $0x18] sm:$0xff] }
  0x11   :  { %s120_s18 = sld [smem:[#allocation3 + $0x4]]  ;;  %s121_s19 = sld [smem:[#allocation3 + $0x5]] }
  0x12   :  { %s122_s0 = sld [smem:[#allocation3 + $0x6]]  ;;  %s123_s20 = sld [smem:[#allocation3 + $0x7]] }
  0x13   :  { %s128_s25 = sld [smem:[#allocation3 + $0xc]]  ;;  %s129_s26 = sld [smem:[#allocation3 + $0xd]] }
  0x14   :  { %s124_s1 = sld [smem:[#allocation3 + $0x8]]  ;;  %s126_s3 = sld [smem:[#allocation3 + $0xa]] }
  0x15   :  { %v25_v2 = vstv %s24_s14  ;;  %v27_v3 = vstv %s117_s15  ;;  %s125_s4 = sld [smem:[#allocation3 + $0x9]]  ;;  %s127_s5 = sld [smem:[#allocation3 + $0xb]] }
  0x16   :  { %v29_v5 = vstv %s118_s16  ;;  %v31_v6 = vstv %s119_s17  ;;  %v75_v8 = vmul.f32 %v60_v0, %v25_v2  ;;  %v76_v9 = vmul.f32 %v61_v1, %v27_v3  ;;  %s130_s6 = sld [smem:[#allocation3 + $0xe]]  ;;  %s131_s7 = sld [smem:[#allocation3 + $0xf]] }
  0x17   :  { %v33_v10 = vstv %s120_s18  ;;  %v35_v11 = vstv %s121_s19  ;;  %v83_v12 = vmul.f32 %v60_v0, %v29_v5  ;;  %v84_v13 = vmul.f32 %v61_v1, %v31_v6 }
  0x18   :  { %v37_v14 = vstv %s122_s0  ;;  %v39_v15 = vstv %s123_s20  ;;  %v78_v16 = vmul.f32 %v62_v4, %v33_v10  ;;  %v77_v17 = vadd.f32 %v76_v9, %v75_v8 }
  0x19   :  { %v79_v18 = vmul.f32 %v63_v7, %v35_v11  ;;  %v85_v19 = vadd.f32 %v84_v13, %v83_v12  ;;  %v86_v20 = vmul.f32 %v62_v4, %v37_v14  ;;  %v87_v21 = vmul.f32 %v63_v7, %v39_v15 }
  0x1a   :  { %v49_v23 = vstv %s128_s25  ;;  %v51_v25 = vstv %s129_s26  ;;  %v41_v30 = vstv %s124_s1  ;;  %v45_v31 = vstv %s126_s3 }
  0x1b   :  { %v80_v22 = vadd.f32 %v79_v18, %v78_v16  ;;  %v88_v24 = vadd.f32 %v87_v21, %v86_v20  ;;  %v43_v32 = vstv %s125_s4  ;;  %v47_v33 = vstv %s127_s5 }
  0x1c   :  { %v53_v40 = vstv %s130_s6  ;;  %v55_v41 = vstv %s131_s7 }
  0x1d   :  { %v81_v26 = vadd.f32 %v80_v22, %v77_v17  ;;  %v89_v27 = vadd.f32 %v88_v24, %v85_v19 }
  0x1f   :  { %v82_v28 = vadd.f32 %v81_v26, %v49_v23  ;;  %v90_v29 = vadd.f32 %v89_v27, %v51_v25 }
  0x21   :  { %136 = vtanh.f32 %v82_v28 }
  0x22   :  { %138 = vtanh.f32 %v90_v29 }
  0x2b   :  { %v137_v34 = vpop.eup %136 }
  0x2c   :  { %v139_v35 = vpop.eup %138  ;;  %v93_v36 = vmul.f32 %v137_v34, %v41_v30  ;;  %133 = vst [vmem:[%s199_s2 + $0x10] sm:$0xff] %v137_v34  ;;  %v97_v37 = vmul.f32 %v137_v34, %v45_v31 }
  0x2d   :  { %v94_v38 = vmul.f32 %v139_v35, %v43_v32  ;;  %134 = vst [vmem:[%s199_s2 + $0x18] sm:$0xff] %v139_v35  ;;  %v98_v39 = vmul.f32 %v139_v35, %v47_v33 }
  0x2f   :  { %v95_v42 = vadd.f32 %v94_v38, %v93_v36  ;;  %v99_v43 = vadd.f32 %v98_v39, %v97_v37 }
  0x31   :  { %v96_v44 = vadd.f32 %v95_v42, %v53_v40  ;;  %v100_v45 = vadd.f32 %v99_v43, %v55_v41 }
  0x33   :  { %101 = vst [vmem:[%s199_s2] sm:$0xff] %v96_v44  ;;  %132 = vst [vmem:[%s199_s2 + $0x8] sm:$0xff] %v100_v45 }
  0x34   :  { %116 = vsyncpa [#allocation4], 1 }

</bundles_post_ra>
